<compile_context>
chip_gen: v5e
topology: v5e:2x2
jax: 0.10.0
libtpu: 0.0.40
codegen_flags: <defaults>
</compile_context>

<pallas_src>
import functools

import jax
import jax.numpy as jnp
from jax.experimental import pallas as pl
from jax.experimental.pallas import tpu as pltpu


def _round_up(x, m):
    return ((x + m - 1) // m) * m


def gaussian_classifier_kernel(x_ref, w1_ref, b1_ref, w2_ref, b2_ref,
                               w3_ref, b3_ref, w4_ref, b4_ref, out_ref,
                               *, tb, n):
    # x_ref block: (TB*N, 8) bf16 — TB samples with their tokens flattened.
    x = x_ref[...]                                                    # bf16 (TB*N, 8)

    # embed: Linear(8,128) + ReLU   (bf16 operands, f32 accumulation)
    h = jnp.dot(x, w1_ref[...], preferred_element_type=jnp.float32) + b1_ref[...]
    h = jnp.maximum(h, 0.0)                                           # f32 (TB*N, 128)

    # embed: Linear(128,128) + ReLU
    h = jnp.dot(h.astype(jnp.bfloat16), w2_ref[...],
                preferred_element_type=jnp.float32) + b2_ref[...]
    h = jnp.maximum(h, 0.0)                                           # f32 (TB*N, 128)

    # mean pool over tokens: regroup to (TB, N, 128), sum over token axis.
    # (1/N is folded into w3 by the wrapper, so a plain f32 sum is exact.)
    pooled = jnp.sum(h.reshape(tb, n, h.shape[-1]), axis=1)           # f32 (TB, 128)

    # classifier: Linear(128, 64->128 padded) + ReLU   (lane-dense hidden)
    c = jnp.dot(pooled.astype(jnp.bfloat16), w3_ref[...],
                preferred_element_type=jnp.float32) + b3_ref[...]
    c = jnp.maximum(c, 0.0)                                           # f32 (TB, 128)

    # classifier: Linear(64->128 padded, C_pad) — lane-dense output store.
    logits = jnp.dot(c.astype(jnp.bfloat16), w4_ref[...],
                     preferred_element_type=jnp.float32) + b4_ref[...]
    out_ref[...] = logits.astype(out_ref.dtype)                       # f32 (TB, C_pad)


def gaussian_classifier(x, params, *, tb=1024):
    """x: (B, N, 8) float32. params: dict of (in,out) f32 weights / (1,out) f32 biases.

    Processes TB samples per grid step with bf16 matmul operands and f32
    accumulation. Batch, classifier-hidden and class dims are zero-padded for
    lane/sublane alignment and sliced off before returning.
    """
    B, N, D = x.shape
    assert D == 8
    w1, b1 = params["w1"], params["b1"]
    w2, b2 = params["w2"], params["b2"]
    w3, b3 = params["w3"], params["b3"]
    w4, b4 = params["w4"], params["b4"]
    H2 = w3.shape[1]            # classifier hidden (64)
    C = w4.shape[1]             # num_classes

    LANE = 128
    SUBLANE = 8

    # --- tile selection -------------------------------------------------------
    # Multiple of 8 (sublane alignment), no larger than the padded batch, capped
    # at 1024 so the working set (~12-16 MiB incl. the lane-padded x tile and
    # double buffers) stays well inside v7x's 64 MiB VMEM.
    tb = max(SUBLANE, min(int(tb), 1024))
    tb = max(SUBLANE, _round_up(min(tb, _round_up(B, SUBLANE)), SUBLANE))
    # If the tile would collapse the grid to one step while the batch spans
    # more than one sublane tile, halve it so both v7x TensorCores get work.
    if tb >= _round_up(B, SUBLANE) and B > SUBLANE:
        tb = max(SUBLANE, _round_up(_round_up(B, SUBLANE) // 2, SUBLANE))
    B_pad = _round_up(B, tb)
    n_steps = B_pad // tb

    if B_pad != B:
        x = jnp.pad(x, ((0, B_pad - B), (0, 0), (0, 0)))

    # Flatten tokens into rows and cast the input to bf16 (halves input DMA).
    x_flat = x.reshape(B_pad * N, D).astype(jnp.bfloat16)

    # --- weight prep ----------------------------------------------------------
    # Fold the mean-pool's 1/N into w3; pad classifier hidden 64 -> 128 lanes and
    # the class dim to a lane-dense width; cast matmul operands to bf16.
    H_pad = _round_up(H2, LANE)
    C_pad = _round_up(C, LANE)

    w1_k = w1.astype(jnp.bfloat16)
    w2_k = w2.astype(jnp.bfloat16)
    w3_k = jnp.pad(w3 * (1.0 / N), ((0, 0), (0, H_pad - H2))).astype(jnp.bfloat16)
    b3_k = jnp.pad(b3, ((0, 0), (0, H_pad - H2)))
    w4_k = jnp.pad(w4, ((0, H_pad - H2), (0, C_pad - C))).astype(jnp.bfloat16)
    b4_k = jnp.pad(b4, ((0, 0), (0, C_pad - C)))
    # biases stay f32 (added to the f32 accumulator)
    b1_k, b2_k = b1, b2

    def full_spec(shape):
        # whole-array block, same tile every grid step (weights/biases)
        return pl.BlockSpec(shape, lambda i: tuple(0 for _ in shape))

    kernel = functools.partial(gaussian_classifier_kernel, tb=tb, n=N)

    out_pad = pl.pallas_call(
        kernel,
        out_shape=jax.ShapeDtypeStruct((B_pad, C_pad), jnp.float32),
        grid_spec=pltpu.PrefetchScalarGridSpec(
            num_scalar_prefetch=0,
            grid=(n_steps,),
            in_specs=[
                pl.BlockSpec((tb * N, D), lambda i: (i, 0)),   # x: TB samples/step
                full_spec(w1_k.shape), full_spec(b1_k.shape),
                full_spec(w2_k.shape), full_spec(b2_k.shape),
                full_spec(w3_k.shape), full_spec(b3_k.shape),
                full_spec(w4_k.shape), full_spec(b4_k.shape),
            ],
            out_specs=pl.BlockSpec((tb, C_pad), lambda i: (i, 0)),
        ),
        compiler_params=pltpu.CompilerParams(
            dimension_semantics=("parallel",),
            vmem_limit_bytes=40 * 1024 * 1024,
        ),
    )(x_flat, w1_k, b1_k, w2_k, b2_k, w3_k, b3_k, w4_k, b4_k)

    # Drop batch padding and class-lane padding.
    return out_pad[:B, :C]


def init_params(key, num_classes):
    """Deterministic parameter init (same shapes as the PyTorch module)."""
    def linear(key, fan_in, fan_out):
        kw, kb = jax.random.split(key)
        bound = 1.0 / jnp.sqrt(fan_in)
        # stored as (in, out) so kernel does x @ W + b  (== PyTorch x @ W_pt.T + b)
        w = jax.random.uniform(kw, (fan_in, fan_out), jnp.float32, -bound, bound)
        b = jax.random.uniform(kb, (1, fan_out), jnp.float32, -bound, bound)
        return w, b

    k1, k2, k3, k4 = jax.random.split(key, 4)
    w1, b1 = linear(k1, 8, 128)
    w2, b2 = linear(k2, 128, 128)
    w3, b3 = linear(k3, 128, 64)
    w4, b4 = linear(k4, 64, num_classes)
    return {"w1": w1, "b1": b1, "w2": w2, "b2": b2,
            "w3": w3, "b3": b3, "w4": w4, "b4": b4}


def reference_forward_f32(x, p):
    """Pure-JAX f32 reference identical to the PyTorch forward."""
    h = jnp.maximum(x @ p["w1"] + p["b1"], 0.0)
    h = jnp.maximum(h @ p["w2"] + p["b2"], 0.0)
    h = h.mean(axis=1)
    c = jnp.maximum(h @ p["w3"] + p["b3"], 0.0)
    return c @ p["w4"] + p["b4"]


def reference_forward_bf16(x, p):
    """Pure-JAX reference reproducing the kernel's bf16-operand / f32-accum math."""
    bf16, f32 = jnp.bfloat16, jnp.float32
    B, N, D = x.shape
    w1 = p["w1"].astype(bf16)
    w2 = p["w2"].astype(bf16)
    w3 = (p["w3"] * (1.0 / N)).astype(bf16)
    w4 = p["w4"].astype(bf16)
    xb = x.reshape(B * N, D).astype(bf16)
    h = jnp.maximum(jnp.dot(xb, w1, preferred_element_type=f32) + p["b1"], 0.0)
    h = jnp.maximum(jnp.dot(h.astype(bf16), w2, preferred_element_type=f32) + p["b2"], 0.0)
    pooled = jnp.sum(h.reshape(B, N, -1), axis=1)
    c = jnp.maximum(jnp.dot(pooled.astype(bf16), w3, preferred_element_type=f32) + p["b3"], 0.0)
    return jnp.dot(c.astype(bf16), w4, preferred_element_type=f32) + p["b4"]


if __name__ == "__main__":
    num_classes = 10
    key = jax.random.PRNGKey(0)
    kx, kx2, kp = jax.random.split(key, 3)
    params = init_params(kp, num_classes)

    # Small shape consistent with forward(x): (B, N, 8)
    B, N, D = 2, 8, 8
    x = jax.random.normal(kx, (B, N, D), jnp.float32)
    out = jax.block_until_ready(gaussian_classifier(x, params))
    assert out.shape == (B, num_classes)
    ref_bf16 = reference_forward_bf16(x, params)
    ref_f32 = reference_forward_f32(x, params)
    assert jnp.allclose(out, ref_bf16, atol=1e-3, rtol=1e-3), "mismatch vs bf16 ref (B=2)"
    assert jnp.allclose(out, ref_f32, atol=5e-2, rtol=5e-2), "mismatch vs f32 ref (B=2)"

    # Batch not divisible by the tile, explicit small tile -> multiple grid steps
    # (exercises the padding path and the parallel batch axis).
    B2 = 20
    x2 = jax.random.normal(kx2, (B2, N, D), jnp.float32)
    out2 = jax.block_until_ready(gaussian_classifier(x2, params, tb=8))
    assert out2.shape == (B2, num_classes)
    ref2_bf16 = reference_forward_bf16(x2, params)
    ref2_f32 = reference_forward_f32(x2, params)
    assert jnp.allclose(out2, ref2_bf16, atol=1e-3, rtol=1e-3), "mismatch vs bf16 ref (B=20)"
    assert jnp.allclose(out2, ref2_f32, atol=5e-2, rtol=5e-2), "mismatch vs f32 ref (B=20)"

    # Default (large) tile on the same batch -> exercises the tile-halving path
    # that guarantees >= 2 grid steps for dual-TensorCore sharding.
    out3 = jax.block_until_ready(gaussian_classifier(x2, params))
    assert out3.shape == (B2, num_classes)
    assert jnp.allclose(out3, ref2_bf16, atol=1e-3, rtol=1e-3), "mismatch vs bf16 ref (default tb)"

    print("KERNEL_OK")
</pallas_src>

<mosaic_0001>
module attributes {stable_mosaic.version = 11 : i64} {
  func.func @gaussian_classifier_kernel(%arg0: i32, %arg1: memref<64x8xbf16, #tpu.memory_space<vmem>>, %arg2: memref<8x128xbf16, #tpu.memory_space<vmem>>, %arg3: memref<1x128xf32, #tpu.memory_space<vmem>>, %arg4: memref<128x128xbf16, #tpu.memory_space<vmem>>, %arg5: memref<1x128xf32, #tpu.memory_space<vmem>>, %arg6: memref<128x128xbf16, #tpu.memory_space<vmem>>, %arg7: memref<1x128xf32, #tpu.memory_space<vmem>>, %arg8: memref<128x128xbf16, #tpu.memory_space<vmem>>, %arg9: memref<1x128xf32, #tpu.memory_space<vmem>>, %arg10: memref<8x128xf32, #tpu.memory_space<vmem>>) attributes {dimension_semantics = [#tpu.dimension_semantics<parallel>], iteration_bounds = array<i64: 1>, scalar_prefetch = 0 : i64, scratch_operands = 0 : i64, tpu.core_type = #tpu.core_type<tc>, window_params = [{transform_indices = @transform_0, window_bounds = array<i64: 64, 8>}, {pipeline_mode = #tpu.pipeline_mode<synchronous>, transform_indices = @transform_1, window_bounds = array<i64: 8, 128>}, {pipeline_mode = #tpu.pipeline_mode<synchronous>, transform_indices = @transform_2, window_bounds = array<i64: 1, 128>}, {pipeline_mode = #tpu.pipeline_mode<synchronous>, transform_indices = @transform_3, window_bounds = array<i64: 128, 128>}, {pipeline_mode = #tpu.pipeline_mode<synchronous>, transform_indices = @transform_4, window_bounds = array<i64: 1, 128>}, {pipeline_mode = #tpu.pipeline_mode<synchronous>, transform_indices = @transform_5, window_bounds = array<i64: 128, 128>}, {pipeline_mode = #tpu.pipeline_mode<synchronous>, transform_indices = @transform_6, window_bounds = array<i64: 1, 128>}, {pipeline_mode = #tpu.pipeline_mode<synchronous>, transform_indices = @transform_7, window_bounds = array<i64: 128, 128>}, {pipeline_mode = #tpu.pipeline_mode<synchronous>, transform_indices = @transform_8, window_bounds = array<i64: 1, 128>}, {transform_indices = @transform_9, window_bounds = array<i64: 8, 128>}]} {
    %c0 = arith.constant 0 : index
    %c0_0 = arith.constant 0 : index
    %0 = vector.load %arg1[%c0, %c0_0] : memref<64x8xbf16, #tpu.memory_space<vmem>>, vector<64x8xbf16>
    %c0_1 = arith.constant 0 : index
    %c0_2 = arith.constant 0 : index
    %1 = vector.load %arg2[%c0_1, %c0_2] : memref<8x128xbf16, #tpu.memory_space<vmem>>, vector<8x128xbf16>
    %cst = arith.constant dense<0.000000e+00> : vector<64x128xf32>
    %2 = tpu.matmul %0, %1, %cst {dimension_numbers = #tpu.dot_dimension_numbers<[1], [0], [0], [1], [0, 0, 1, 1], [], []>} : vector<64x8xbf16>, vector<8x128xbf16>, vector<64x128xf32> -> vector<64x128xf32>
    %c0_3 = arith.constant 0 : index
    %c0_4 = arith.constant 0 : index
    %3 = vector.load %arg3[%c0_3, %c0_4] : memref<1x128xf32, #tpu.memory_space<vmem>>, vector<1x128xf32>
    %4 = vector.broadcast %3 : vector<1x128xf32> to vector<64x128xf32>
    %5 = arith.addf %2, %4 : vector<64x128xf32>
    %cst_5 = arith.constant 0.000000e+00 : f32
    %6 = vector.broadcast %cst_5 : f32 to vector<64x128xf32>
    %7 = arith.maximumf %5, %6 : vector<64x128xf32>
    %8 = arith.truncf %7 : vector<64x128xf32> to vector<64x128xbf16>
    %c0_6 = arith.constant 0 : index
    %c0_7 = arith.constant 0 : index
    %9 = vector.load %arg4[%c0_6, %c0_7] : memref<128x128xbf16, #tpu.memory_space<vmem>>, vector<128x128xbf16>
    %cst_8 = arith.constant dense<0.000000e+00> : vector<64x128xf32>
    %10 = tpu.matmul %8, %9, %cst_8 {dimension_numbers = #tpu.dot_dimension_numbers<[1], [0], [0], [1], [0, 0, 1, 1], [], []>} : vector<64x128xbf16>, vector<128x128xbf16>, vector<64x128xf32> -> vector<64x128xf32>
    %c0_9 = arith.constant 0 : index
    %c0_10 = arith.constant 0 : index
    %11 = vector.load %arg5[%c0_9, %c0_10] : memref<1x128xf32, #tpu.memory_space<vmem>>, vector<1x128xf32>
    %12 = vector.broadcast %11 : vector<1x128xf32> to vector<64x128xf32>
    %13 = arith.addf %10, %12 : vector<64x128xf32>
    %cst_11 = arith.constant 0.000000e+00 : f32
    %14 = vector.broadcast %cst_11 : f32 to vector<64x128xf32>
    %15 = arith.maximumf %13, %14 : vector<64x128xf32>
    %16 = vector.shape_cast %15 : vector<64x128xf32> to vector<8x8x128xf32>
    %cst_12 = arith.constant dense<0.000000e+00> : vector<8x128xf32>
    %17 = vector.multi_reduction <add>, %16, %cst_12 [1] : vector<8x8x128xf32> to vector<8x128xf32>
    %18 = arith.truncf %17 : vector<8x128xf32> to vector<8x128xbf16>
    %c0_13 = arith.constant 0 : index
    %c0_14 = arith.constant 0 : index
    %19 = vector.load %arg6[%c0_13, %c0_14] : memref<128x128xbf16, #tpu.memory_space<vmem>>, vector<128x128xbf16>
    %cst_15 = arith.constant dense<0.000000e+00> : vector<8x128xf32>
    %20 = tpu.matmul %18, %19, %cst_15 {dimension_numbers = #tpu.dot_dimension_numbers<[1], [0], [0], [1], [0, 0, 1, 1], [], []>} : vector<8x128xbf16>, vector<128x128xbf16>, vector<8x128xf32> -> vector<8x128xf32>
    %c0_16 = arith.constant 0 : index
    %c0_17 = arith.constant 0 : index
    %21 = vector.load %arg7[%c0_16, %c0_17] : memref<1x128xf32, #tpu.memory_space<vmem>>, vector<1x128xf32>
    %22 = vector.broadcast %21 : vector<1x128xf32> to vector<8x128xf32>
    %23 = arith.addf %20, %22 : vector<8x128xf32>
    %cst_18 = arith.constant 0.000000e+00 : f32
    %24 = vector.broadcast %cst_18 : f32 to vector<8x128xf32>
    %25 = arith.maximumf %23, %24 : vector<8x128xf32>
    %26 = arith.truncf %25 : vector<8x128xf32> to vector<8x128xbf16>
    %c0_19 = arith.constant 0 : index
    %c0_20 = arith.constant 0 : index
    %27 = vector.load %arg8[%c0_19, %c0_20] : memref<128x128xbf16, #tpu.memory_space<vmem>>, vector<128x128xbf16>
    %cst_21 = arith.constant dense<0.000000e+00> : vector<8x128xf32>
    %28 = tpu.matmul %26, %27, %cst_21 {dimension_numbers = #tpu.dot_dimension_numbers<[1], [0], [0], [1], [0, 0, 1, 1], [], []>} : vector<8x128xbf16>, vector<128x128xbf16>, vector<8x128xf32> -> vector<8x128xf32>
    %c0_22 = arith.constant 0 : index
    %c0_23 = arith.constant 0 : index
    %29 = vector.load %arg9[%c0_22, %c0_23] : memref<1x128xf32, #tpu.memory_space<vmem>>, vector<1x128xf32>
    %30 = vector.broadcast %29 : vector<1x128xf32> to vector<8x128xf32>
    %31 = arith.addf %28, %30 : vector<8x128xf32>
    %c0_24 = arith.constant 0 : index
    %c0_25 = arith.constant 0 : index
    %32 = vector.load %arg10[%c0_24, %c0_25] : memref<8x128xf32, #tpu.memory_space<vmem>>, vector<8x128xf32>
    tpu.vector_store %arg10[%c0_24, %c0_25], %31 {strides = array<i32>} : memref<8x128xf32, #tpu.memory_space<vmem>>, vector<8x128xf32>,
    return
  }
  func.func @transform_0(%arg0: i32) -> (i32, i32) {
    %c0_i32 = arith.constant 0 : i32
    %c0_i32_0 = arith.constant 0 : i32
    return %arg0, %c0_i32 : i32, i32
  }
  func.func @transform_1(%arg0: i32) -> (i32, i32) {
    %c0_i32 = arith.constant 0 : i32
    %c0_i32_0 = arith.constant 0 : i32
    %c0_i32_1 = arith.constant 0 : i32
    return %c0_i32, %c0_i32_0 : i32, i32
  }
  func.func @transform_2(%arg0: i32) -> (i32, i32) {
    %c0_i32 = arith.constant 0 : i32
    %c0_i32_0 = arith.constant 0 : i32
    %c0_i32_1 = arith.constant 0 : i32
    return %c0_i32, %c0_i32_0 : i32, i32
  }
  func.func @transform_3(%arg0: i32) -> (i32, i32) {
    %c0_i32 = arith.constant 0 : i32
    %c0_i32_0 = arith.constant 0 : i32
    %c0_i32_1 = arith.constant 0 : i32
    return %c0_i32, %c0_i32_0 : i32, i32
  }
  func.func @transform_4(%arg0: i32) -> (i32, i32) {
    %c0_i32 = arith.constant 0 : i32
    %c0_i32_0 = arith.constant 0 : i32
    %c0_i32_1 = arith.constant 0 : i32
    return %c0_i32, %c0_i32_0 : i32, i32
  }
  func.func @transform_5(%arg0: i32) -> (i32, i32) {
    %c0_i32 = arith.constant 0 : i32
    %c0_i32_0 = arith.constant 0 : i32
    %c0_i32_1 = arith.constant 0 : i32
    return %c0_i32, %c0_i32_0 : i32, i32
  }
  func.func @transform_6(%arg0: i32) -> (i32, i32) {
    %c0_i32 = arith.constant 0 : i32
    %c0_i32_0 = arith.constant 0 : i32
    %c0_i32_1 = arith.constant 0 : i32
    return %c0_i32, %c0_i32_0 : i32, i32
  }
  func.func @transform_7(%arg0: i32) -> (i32, i32) {
    %c0_i32 = arith.constant 0 : i32
    %c0_i32_0 = arith.constant 0 : i32
    %c0_i32_1 = arith.constant 0 : i32
    return %c0_i32, %c0_i32_0 : i32, i32
  }
  func.func @transform_8(%arg0: i32) -> (i32, i32) {
    %c0_i32 = arith.constant 0 : i32
    %c0_i32_0 = arith.constant 0 : i32
    %c0_i32_1 = arith.constant 0 : i32
    return %c0_i32, %c0_i32_0 : i32, i32
  }
  func.func @transform_9(%arg0: i32) -> (i32, i32) {
    %c0_i32 = arith.constant 0 : i32
    %c0_i32_0 = arith.constant 0 : i32
    return %arg0, %c0_i32 : i32, i32
  }
}

</mosaic_0001>

<bundles_post_ra>
// kernel: tpu_custom_call.1
= control target key start
LH: loop header
LB: loop body
LE: loop exit
PB: predicated region body
PF: predicated region fallthrough
CT: control target
= control target key end

     0   :  { %14 = vsyncpa [#allocation3], 0  ;;  %s909_s0 = inlined_call_operand.vmem [shape: bf16[64,8], index: 0, kind: input, shape index: {}]   ;;  %s910_s1 = inlined_call_operand.vmem [shape: bf16[8,128], index: 1, kind: input, shape index: {}]   ;;  %s911_s2 = inlined_call_operand.vmem [shape: f32[1,128], index: 2, kind: input, shape index: {}]   ;;  %s912_s3 = inlined_call_operand.hbm [shape: bf16[128,128], index: 3, kind: input, shape index: {}]   ;;  %s913_s4 = inlined_call_operand.vmem [shape: f32[1,128], index: 4, kind: input, shape index: {}]   ;;  %s914_s5 = inlined_call_operand.hbm [shape: bf16[128,128], index: 5, kind: input, shape index: {}]   ;;  %s915_s6 = inlined_call_operand.vmem [shape: f32[1,128], index: 6, kind: input, shape index: {}]   ;;  %s916_s7 = inlined_call_operand.hbm [shape: bf16[128,128], index: 7, kind: input, shape index: {}]   ;;  %s917_s8 = inlined_call_operand.vmem [shape: f32[1,128], index: 8, kind: input, shape index: {}]   ;;  %s918_s9 = inlined_call_operand.hbm [shape: f32[8,128], index: 9, kind: output, shape index: {}]  }
   0x1   :  { %15 = vsyncpa [#allocation6], 0 }
   0x2   :  { %16 = vsyncpa [#allocation4], 0  ;;  %s42_s11 = sshll.u32 %s914_s5, 4  ;;  %s804_s12 = smov [#allocation5]   ;;  %s43_s11 = int_to_ptr.hbm [resolvable:$true] %s42_s11 }
   0x3   :  { %s44_s13 = sshll.u32 %s804_s12, 4  ;;  %s27_s16 = sshll.u32 %s912_s3, 4  ;;  %s45_s13 = int_to_ptr.vmem [resolvable:$true] %s44_s13  ;;  %s28_s16 = int_to_ptr.hbm [resolvable:$true] %s27_s16 }
   0x4   :  { %s805_s17 = smov 64   ;;  %s806_s18 = smov 4  }
   0x5   :  { %50 = dma.hbm_to_vmem [thread:$0]  %s43_s11, 1024, %s45_s13, [#allocation6], %s805_s17, %s805_s17, %s806_s18  }
   0x6   :  { %s807_s19 = smov [#allocation2]   ;;  %s57_s23 = sshll.u32 %s916_s7, 4  ;;  %s58_s23 = int_to_ptr.hbm [resolvable:$true] %s57_s23 }
   0x7   :  { %s29_s20 = sshll.u32 %s807_s19, 4  ;;  %s808_s5 = smov [#allocation7]   ;;  %s30_s20 = int_to_ptr.vmem [resolvable:$true] %s29_s20 }
   0x8   :  { %35 = dma.hbm_to_vmem [thread:$0]  %s28_s16, 1024, %s30_s20, [#allocation3], %s805_s17, %s805_s17, %s806_s18  }
   0x9   :  { %s59_s24 = sshll.u32 %s808_s5, 4  ;;  %s60_s24 = int_to_ptr.vmem [resolvable:$true] %s59_s24 }
   0xa   :  { %65 = dma.hbm_to_vmem [thread:$0]  %s58_s23, 1024, %s60_s24, [#allocation6], %s805_s17, %s805_s17, %s806_s18  }
   0xb   :  { %798 = dma.done.wait [#allocation3], 1024  }
   0xc   :  { %799 = vsyncadd [#allocation3], 4294966272 }
   0xd   :  { %800 = dma.done.wait [#allocation6], 2048  }
   0xe   :  { %801 = vsyncadd [#allocation6], 4294965248  ;;  %vm127_vm0 = vcmask 1043456   ;;  %v89_v0 = vld [vmem:[%s910_s1] sm:$0xf]  ;;  %vm114_vm1 = vcmask 64512  }
   0xf   :  { %v129_v1 = vsel %vm127_vm0, %v89_v0, 0  ;;  %v664_v2 = vld [vmem:[%s909_s0] sm:$0xff]  ;;  %v665_v3 = vld [vmem:[%s909_s0 + $0x8] sm:$0xff]  ;;  %v675_v4 = vld [vmem:[#allocation2 + $0x38] sm:$0xff]  ;;  %vm369_vm2 = vcmask 1041409   ;;  %vm371_vm3 = vcmask 1042434  }
  0x10   :  { %138 = vmatpush.bf16.msra.mxu0 %v129_v1  ;;  %240 = vmatpush.bf16.msra.mxu1 %v675_v4  ;;  %v674_v5 = vld [vmem:[#allocation2 + $0x30] sm:$0xff]  ;;  %v673_v6 = vld [vmem:[#allocation2 + $0x28] sm:$0xff]  ;;  %v672_v7 = vld [vmem:[#allocation2 + $0x20] sm:$0xff]  ;;  %vm373_vm4 = vcmask 1043459   ;;  %vm375_vm5 = vcmask 1044484   ;;  %vm377_vm6 = vcmask 1045509  }
  0x11   :  { %v666_v8 = vld [vmem:[%s909_s0 + $0x10] sm:$0xff]  ;;  %v667_v9 = vld [vmem:[%s909_s0 + $0x18] sm:$0xff]  ;;  %v669_v12 = vld [vmem:[#allocation2 + $0x8] sm:$0xff]  ;;  %vm379_vm7 = vcmask 1046534   ;;  %vm381_vm8 = vcmask 1047559   ;;  %s809_s16 = smov [#allocation8]  }
  0x12   :  { %v671_v10 = vld [vmem:[#allocation2 + $0x18] sm:$0xff]  ;;  %v670_v11 = vld [vmem:[#allocation2 + $0x10] sm:$0xff]  ;;  %v668_v13 = vld [vmem:[#allocation2] sm:$0xff]  ;;  %s535_s17 = sshll.u32 %s809_s16, 4  ;;  %s537_s20 = sshll.u32 %s918_s9, 4  ;;  %s536_s17 = int_to_ptr.vmem [resolvable:$true] %s535_s17  ;;  %s538_s20 = int_to_ptr.hbm [resolvable:$true] %s537_s20 }
  0x13   :  { %564 = vmatmul.msk.bf16.vlgmr.msra.gmra.mxu0 %vm114_vm1, %v664_v2  ;;  %v698_v15 = vld [vmem:[%s911_s2] ss:$0 sm:$0xff]  ;;  %v683_v45 = vld [vmem:[#allocation5 + $0x38] sm:$0xff]  ;;  %v682_v47 = vld [vmem:[#allocation5 + $0x30] sm:$0xff] }
  0x14   :  { %241 = vmatpush.bf16.msra.mxu1 %v674_v5  ;;  %433 = vmatpush.bf16.msra.mxu2 %v683_v45  ;;  %v681_v48 = vld [vmem:[#allocation5 + $0x28] sm:$0xff]  ;;  %v680_v50 = vld [vmem:[#allocation5 + $0x20] sm:$0xff]  ;;  %v679_v53 = vld [vmem:[#allocation5 + $0x18] sm:$0xff] }
  0x15   :  { %v890_v51 = vld [vmem:[%s913_s4] ss:$0 sm:$0xff]  ;;  %v678_v60 = vld [vmem:[#allocation5 + $0x10] sm:$0xff]  ;;  %v677_v2 = vld [vmem:[#allocation5 + $0x8] sm:$0xff] }
  0x18   :  { %242 = vmatpush.bf16.msra.mxu1 %v673_v6  ;;  %434 = vmatpush.bf16.msra.mxu2 %v682_v47 }
  0x1c   :  { %243 = vmatpush.bf16.msra.mxu1 %v672_v7  ;;  %435 = vmatpush.bf16.msra.mxu2 %v681_v48 }
  0x20   :  { %244 = vmatpush.bf16.msra.mxu1 %v671_v10  ;;  %436 = vmatpush.bf16.msra.mxu2 %v680_v50 }
  0x23   :  { %565 = vmatmul.msk.bf16.gmra.mxu0 %vm114_vm1, %v665_v3 }
  0x24   :  { %245 = vmatpush.bf16.msra.mxu1 %v670_v11  ;;  %437 = vmatpush.bf16.msra.mxu2 %v679_v53 }
  0x28   :  { %246 = vmatpush.bf16.msra.mxu1 %v669_v12  ;;  %438 = vmatpush.bf16.msra.mxu2 %v678_v60 }
  0x2c   :  { %247 = vmatpush.bf16.msra.mxu1 %v668_v13  ;;  %439 = vmatpush.bf16.msra.mxu2 %v677_v2 }
  0x33   :  { %566 = vmatmul.msk.bf16.gmra.mxu0 %vm114_vm1, %v666_v8  ;;  %v676_v8 = vld [vmem:[#allocation5] sm:$0xff] }
  0x34   :  { %440 = vmatpush.bf16.msra.mxu2 %v676_v8 }
  0x43   :  { %567 = vmatmul.msk.bf16.gmra.mxu0 %vm114_vm1, %v667_v9 }
  0x90   :  { %v140_v14 = vpop.f32.mrf.mxu0 }
  0x91   :  { %v141_v16 = vadd.f32 %v698_v15, %v140_v14 }
  0x93   :  { %v160_v19 = vmax.f32 %v141_v16, 0.0 }
  0x98   :  { %v142_v17 = vpop.f32.mrf.mxu0 }
  0x99   :  { %v143_v18 = vadd.f32 %v698_v15, %v142_v17 }
  0x9b   :  { %v161_v20 = vmax.f32 %v143_v18, 0.0 }
  0x9d   :  { %v168_v21 = vpack.c.bf16 %v161_v20, %v160_v19 }
  0x9f   :  { %248 = vmatmul.bf16.vlgmr.msra.gmra.mxu1 %v168_v21  ;;  %v691_v21 = vld [vmem:[#allocation7 + $0x38] sm:$0xff] }
  0xa0   :  { %v145_v22 = vpop.f32.mrf.mxu0  ;;  %516 = vmatpush.bf16.msra.mxu3 %v691_v21 }
  0xa1   :  { %v146_v23 = vadd.f32 %v698_v15, %v145_v22 }
  0xa3   :  { %v162_v26 = vmax.f32 %v146_v23, 0.0 }
  0xa8   :  { %v147_v24 = vpop.f32.mrf.mxu0 }
  0xa9   :  { %v148_v25 = vadd.f32 %v698_v15, %v147_v24 }
  0xab   :  { %v163_v27 = vmax.f32 %v148_v25, 0.0 }
  0xad   :  { %v169_v28 = vpack.c.bf16 %v163_v27, %v162_v26  ;;  %v690_v26 = vld [vmem:[#allocation7 + $0x30] sm:$0xff] }
  0xae   :  { %517 = vmatpush.bf16.msra.mxu3 %v690_v26  ;;  %v685_v26 = vld [vmem:[#allocation7 + $0x8] sm:$0xff] }
  0xaf   :  { %253 = vmatmul.bf16.gmra.mxu1 %v169_v28 }
  0xb0   :  { %v150_v29 = vpop.f32.mrf.mxu0 }
  0xb1   :  { %v151_v30 = vadd.f32 %v698_v15, %v150_v29 }
  0xb3   :  { %v164_v33 = vmax.f32 %v151_v30, 0.0 }
  0xb8   :  { %v152_v31 = vpop.f32.mrf.mxu0 }
  0xb9   :  { %v153_v32 = vadd.f32 %v698_v15, %v152_v31 }
  0xbb   :  { %v165_v34 = vmax.f32 %v153_v32, 0.0 }
  0xbd   :  { %v170_v35 = vpack.c.bf16 %v165_v34, %v164_v33 }
  0xbf   :  { %258 = vmatmul.bf16.gmra.mxu1 %v170_v35  ;;  %v689_v35 = vld [vmem:[#allocation7 + $0x28] sm:$0xff] }
  0xc0   :  { %v155_v36 = vpop.f32.mrf.mxu0  ;;  %518 = vmatpush.bf16.msra.mxu3 %v689_v35 }
  0xc1   :  { %v156_v37 = vadd.f32 %v698_v15, %v155_v36 }
  0xc3   :  { %v166_v40 = vmax.f32 %v156_v37, 0.0 }
  0xc8   :  { %v157_v38 = vpop.f32.mrf.mxu0 }
  0xc9   :  { %v158_v39 = vadd.f32 %v698_v15, %v157_v38 }
  0xcb   :  { %v167_v41 = vmax.f32 %v158_v39, 0.0 }
  0xcd   :  { %v171_v42 = vpack.c.bf16 %v167_v41, %v166_v40 }
  0xcf   :  { %263 = vmatmul.bf16.gmra.mxu1 %v171_v42 }
 0x11c   :  { %v249_v43 = vpop.f32.mrf.mxu1 }
 0x11d   :  { %v250_v56 = vadd.f32 %v890_v51, %v249_v43 }
 0x11f   :  { %v269_v62 = vmax.f32 %v250_v56, 0.0 }
 0x121   :  { %v277_v5 = vrot.slane %v269_v62, 4 }
 0x123   :  { %v278_v13 = vadd.f32 %v277_v5, %v269_v62 }
 0x124   :  { %v251_v44 = vpop.f32.mrf.mxu1 }
 0x125   :  { %v252_v52 = vadd.f32 %v890_v51, %v251_v44  ;;  %v279_v22 = vrot.slane %v278_v13, 2 }
 0x127   :  { %v270_v59 = vmax.f32 %v252_v52, 0.0  ;;  %v280_v31 = vadd.f32 %v279_v22, %v278_v13 }
 0x129   :  { %v283_v1 = vrot.slane %v270_v59, 4  ;;  %v281_v41 = vrot.slane %v280_v31, 1 }
 0x12b   :  { %v284_v10 = vadd.f32 %v283_v1, %v270_v59  ;;  %v282_v53 = vadd.f32 %v281_v41, %v280_v31 }
 0x12c   :  { %v254_v46 = vpop.f32.mrf.mxu1 }
 0x12d   :  { %v255_v54 = vadd.f32 %v890_v51, %v254_v46  ;;  %v285_v17 = vrot.slane %v284_v10, 2  ;;  %v688_v46 = vld [vmem:[#allocation7 + $0x20] sm:$0xff] }
 0x12e   :  { %519 = vmatpush.bf16.msra.mxu3 %v688_v46 }
 0x12f   :  { %v271_v61 = vmax.f32 %v255_v54, 0.0  ;;  %v286_v27 = vadd.f32 %v285_v17, %v284_v10 }
 0x131   :  { %v289_v3 = vrot.slane %v271_v61, 4  ;;  %v287_v36 = vrot.slane %v286_v27, 1 }
 0x133   :  { %v290_v12 = vadd.f32 %v289_v3, %v271_v61  ;;  %v288_v47 = vadd.f32 %v287_v36, %v286_v27  ;;  %v686_v3 = vld [vmem:[#allocation7 + $0x10] sm:$0xff]  ;;  %v684_v27 = vld [vmem:[#allocation7] sm:$0xff] }
 0x134   :  { %v256_v49 = vpop.f32.mrf.mxu1 }
 0x135   :  { %v257_v57 = vadd.f32 %v890_v51, %v256_v49  ;;  %v291_v19 = vrot.slane %v290_v12, 2  ;;  %v326_v59 = vpack.c.bf16 %v288_v47, %v288_v47 }
 0x137   :  { %v272_v63 = vmax.f32 %v257_v57, 0.0  ;;  %v292_v30 = vadd.f32 %v291_v19, %v290_v12 }
 0x139   :  { %v295_v6 = vrot.slane %v272_v63, 4  ;;  %v293_v39 = vrot.slane %v292_v30, 1 }
 0x13b   :  { %v296_v14 = vadd.f32 %v295_v6, %v272_v63  ;;  %v294_v52 = vadd.f32 %v293_v39, %v292_v30  ;;  %v325_v63 = vpack.c.bf16 %v282_v53, %v282_v53 }
 0x13c   :  { %v259_v55 = vpop.f32.mrf.mxu1 }
 0x13d   :  { %v260_v58 = vadd.f32 %v890_v51, %v259_v55  ;;  %v297_v23 = vrot.slane %v296_v14, 2  ;;  %v327_v62 = vpack.c.bf16 %v294_v52, %v294_v52 }
 0x13f   :  { %v273_v0 = vmax.f32 %v260_v58, 0.0  ;;  %v298_v32 = vadd.f32 %v297_v23, %v296_v14  ;;  %v687_v58 = vld [vmem:[#allocation7 + $0x18] sm:$0xff] }
 0x140   :  { %520 = vmatpush.bf16.msra.mxu3 %v687_v58 }
 0x141   :  { %v301_v9 = vrot.slane %v273_v0, 4  ;;  %v299_v42 = vrot.slane %v298_v32, 1 }
 0x143   :  { %v302_v16 = vadd.f32 %v301_v9, %v273_v0  ;;  %v300_v54 = vadd.f32 %v299_v42, %v298_v32  ;;  %v361_v9 = vunpack.c.l.b16 %v325_v63 }
 0x144   :  { %v261_v4 = vpop.f32.mrf.mxu1  ;;  %521 = vmatpush.bf16.msra.mxu3 %v686_v3 }
 0x145   :  { %v262_v7 = vadd.f32 %v890_v51, %v261_v4  ;;  %v303_v25 = vrot.slane %v302_v16, 2  ;;  %v328_v0 = vpack.c.bf16 %v300_v54, %v300_v54  ;;  %v362_v4 = vunpack.c.l.b16 %v326_v59 }
 0x147   :  { %v274_v11 = vmax.f32 %v262_v7, 0.0  ;;  %v304_v34 = vadd.f32 %v303_v25, %v302_v16  ;;  %v363_v7 = vunpack.c.l.b16 %v327_v62  ;;  %v364_v10 = vunpack.c.l.b16 %v328_v0 }
 0x148   :  { %v370_v13 = vsel %vm369_vm2, %v362_v4, %v361_v9  ;;  %522 = vmatpush.bf16.msra.mxu3 %v685_v26 }
 0x149   :  { %v307_v15 = vrot.slane %v274_v11, 4  ;;  %v305_v45 = vrot.slane %v304_v34, 1  ;;  %v372_v16 = vsel %vm371_vm3, %v363_v7, %v370_v13 }
 0x14a   :  { %v374_v19 = vsel %vm373_vm4, %v364_v10, %v372_v16 }
 0x14b   :  { %v308_v18 = vadd.f32 %v307_v15, %v274_v11  ;;  %v306_v57 = vadd.f32 %v305_v45, %v304_v34  ;;  %v701_v34 = vld [vmem:[%s917_s8] ss:$0 sm:$0xff] }
 0x14c   :  { %v264_v20 = vpop.f32.mrf.mxu1  ;;  %523 = vmatpush.bf16.msra.mxu3 %v684_v27 }
 0x14d   :  { %v265_v24 = vadd.f32 %v890_v51, %v264_v20  ;;  %v309_v28 = vrot.slane %v308_v18, 2  ;;  %v329_v2 = vpack.c.bf16 %v306_v57, %v306_v57 }
 0x14f   :  { %v275_v29 = vmax.f32 %v265_v24, 0.0  ;;  %v310_v37 = vadd.f32 %v309_v28, %v308_v18  ;;  %v365_v12 = vunpack.c.l.b16 %v329_v2  ;;  %v700_v28 = vld [vmem:[%s915_s6] ss:$0 sm:$0xff] }
 0x151   :  { %v313_v33 = vrot.slane %v275_v29, 4  ;;  %v311_v48 = vrot.slane %v310_v37, 1  ;;  %v376_v20 = vsel %vm375_vm5, %v365_v12, %v374_v19 }
 0x153   :  { %v314_v38 = vadd.f32 %v313_v33, %v275_v29  ;;  %v312_v60 = vadd.f32 %v311_v48, %v310_v37 }
 0x154   :  { %v266_v40 = vpop.f32.mrf.mxu1 }
 0x155   :  { %v315_v43 = vrot.slane %v314_v38, 2  ;;  %v267_v44 = vadd.f32 %v890_v51, %v266_v40  ;;  %v330_v5 = vpack.c.bf16 %v312_v60, %v312_v60 }
 0x157   :  { %v316_v49 = vadd.f32 %v315_v43, %v314_v38  ;;  %v276_v50 = vmax.f32 %v267_v44, 0.0  ;;  %v366_v14 = vunpack.c.l.b16 %v330_v5 }
 0x159   :  { %v317_v55 = vrot.slane %v316_v49, 1  ;;  %v319_v56 = vrot.slane %v276_v50, 4  ;;  %v378_v22 = vsel %vm377_vm6, %v366_v14, %v376_v20 }
 0x15b   :  { %v320_v61 = vadd.f32 %v319_v56, %v276_v50  ;;  %v318_v51 = vadd.f32 %v317_v55, %v316_v49 }
 0x15d   :  { %v321_v1 = vrot.slane %v320_v61, 2  ;;  %v331_v8 = vpack.c.bf16 %v318_v51, %v318_v51 }
 0x15f   :  { %v322_v6 = vadd.f32 %v321_v1, %v320_v61  ;;  %v367_v17 = vunpack.c.l.b16 %v331_v8 }
 0x161   :  { %v323_v11 = vrot.slane %v322_v6, 1  ;;  %v380_v23 = vsel %vm379_vm7, %v367_v17, %v378_v22 }
 0x163   :  { %v324_v15 = vadd.f32 %v323_v11, %v322_v6 }
 0x165   :  { %v332_v18 = vpack.c.bf16 %v324_v15, %v324_v15 }
 0x167   :  { %v368_v21 = vunpack.c.l.b16 %v332_v18 }
 0x169   :  { %v382_v24 = vsel %vm381_vm8, %v368_v21, %v380_v23 }
 0x16a   :  { %v383_v25 = vpack.c.b16 %v382_v24, %v382_v24 }
 0x16c   :  { %441 = vmatmul.bf16.vlgmr.msra.gmra.mxu2 %v383_v25 }
 0x1ef   :  { %v442_v29 = vpop.f32.mrf.mxu2 }
 0x1f0   :  { %v443_v30 = vadd.f32 %v700_v28, %v442_v29 }
 0x1f2   :  { %v446_v31 = vmax.f32 %v443_v30, 0.0 }
 0x1f4   :  { %v447_v32 = vpack.c.bf16 %v446_v31, %v446_v31 }
 0x1f6   :  { %524 = vmatmul.bf16.vlgmr.msra.gmra.mxu3 %v447_v32 }
 0x1f7   :  { %v444_v33 = vpop.f32.mrf.mxu2 }
 0x279   :  { %v525_v35 = vpop.f32.mrf.mxu3 }
 0x27a   :  { %v526_v36 = vadd.f32 %v701_v34, %v525_v35 }
 0x27c   :  { %529 = vst [vmem:[#allocation8] sm:$0xff] %v526_v36 }
 0x27d   :  { %540 = dma.vmem_to_hbm [thread:$0]  %s536_s17, 128, %s538_s20, [#allocation4]  }
 0x281   :  { %v527_v37 = vpop.f32.mrf.mxu3 }
 0x282   :  { %802 = dma.done.wait [#allocation4], 128  }
 0x283   :  { %803 = vsyncadd [#allocation4], 4294967168 }
 0x284   :  { %545 = vsyncpa [#allocation3], 1 }
 0x285   :  { %546 = vsyncpa [#allocation6], 1 }
 0x286   :  { %547 = vsyncpa [#allocation4], 1 }

</bundles_post_ra>
